<compile_context>
chip_gen: v7x
topology: tpu7x:2x2x1
jax: 0.10.0
libtpu: 0.0.40
codegen_flags: <defaults>
</compile_context>

<pallas_src>
import functools

import jax
import jax.numpy as jnp
from jax.experimental import pallas as pl
from jax.experimental.pallas import tpu as pltpu


def _round_up(x, m):
    return ((x + m - 1) // m) * m


def _vmem_capacity_bytes():
    """Physical VMEM per TensorCore; falls back to 128 MiB (v5e/v6e) if the
    trace-time query is unavailable."""
    try:
        return int(pltpu.get_tpu_info().vmem_capacity_bytes)
    except Exception:
        return 128 * 2**20


def _tile_footprint(tm, ti, H, x_bytes, w_bytes, xo_bufs):
    """Per-grid-step VMEM bytes: x/out tiles (xo_bufs-deep), fused gate|up and
    down weight tiles (double-buffered), and the f32 accumulator scratch."""
    return (xo_bufs * tm * H * x_bytes          # x tile
            + xo_bufs * tm * H * x_bytes        # out tile
            + 2 * H * (2 * ti) * w_bytes        # fused [gate|up] weight tile
            + 2 * ti * H * w_bytes              # down weight tile
            + tm * H * 4)                       # f32 accumulator


def _fit_tiles(tm, ti, H, x_bytes, w_bytes, budget, xo_bufs, row_align):
    """Shrink (tm, ti) until the per-step footprint fits the VMEM budget."""
    while _tile_footprint(tm, ti, H, x_bytes, w_bytes, xo_bufs) > budget:
        if tm >= ti and tm > row_align:
            tm = max(_round_up(tm // 2, row_align), row_align)
        elif ti > 128:
            ti = max((ti // 2 // 128) * 128, 128)
        elif tm > row_align:
            tm = max(_round_up(tm // 2, row_align), row_align)
        else:
            break
    return tm, ti


def mlp_kernel(x_ref, wgu_ref, wd_ref, o_ref, acc_ref, *, ti):
    """One (M-tile, I-tile) grid step of down(silu(gate(x)) * up(x)).

    Grid is (M // tm, I // ti); the I axis is a reduction handled with an f32
    VMEM accumulator.  gate and up projections are fused into a single MXU
    matmul against the [gate_j | up_j]-interleaved weight slab.
    """
    j = pl.program_id(1)

    x = x_ref[...]                                                     # (tm, H)
    gu = jnp.dot(x, wgu_ref[...], preferred_element_type=jnp.float32)  # (tm, 2*ti)
    gate = gu[:, :ti]
    up = gu[:, ti:]
    h = gate * jax.nn.sigmoid(gate) * up                               # SiLU * up, f32
    part = jnp.dot(h.astype(wd_ref.dtype), wd_ref[...],
                   preferred_element_type=jnp.float32)                 # (tm, H)

    @pl.when(j == 0)
    def _():
        acc_ref[...] = part          # first step: plain store, no zero-init pass

    @pl.when(j > 0)
    def _():
        acc_ref[...] += part

    @pl.when(j == pl.num_programs(1) - 1)
    def _():
        o_ref[...] = acc_ref[...].astype(o_ref.dtype)


def mlp_pallas(x, w_gate, w_up, w_down, *, tm=None, ti=None, vmem_limit_bytes=None):
    """x: [B, S, H]; w_gate/w_up: [H, I]; w_down: [I, H] -> [B, S, H]."""
    B, S, H = x.shape
    Hg, I = w_gate.shape
    assert Hg == H and w_up.shape == (H, I) and w_down.shape == (I, H)

    M = B * S
    x2 = x.reshape(M, H)

    xbytes = jnp.dtype(x.dtype).itemsize
    wbytes = jnp.dtype(w_gate.dtype).itemsize
    row_align = 16 if x.dtype == jnp.dtype(jnp.bfloat16) else 8

    # ---- Generation-aware VMEM budget & default tiles. -----------------------
    vmem_cap = _vmem_capacity_bytes()
    budget = int(0.8 * vmem_cap)                 # ~20% headroom below physical
    small_vmem = vmem_cap <= 64 * 2**20          # v7x-class TensorCore (64 MiB)
    if small_vmem:
        # Single-buffer the j-invariant x/out blocks so a big M tile still fits.
        xo_bufs = 1
        tm_target = tm if tm is not None else 768
        ti_target = ti if ti is not None else 512
    else:
        # 128 MiB parts (v5e / v6e): large M tile + large I tile.
        xo_bufs = 2
        tm_target = tm if tm is not None else 768
        ti_target = ti if ti is not None else 1024

    # Clamp to the actual problem size, then shrink until the footprint fits.
    tm_eff = min(_round_up(tm_target, row_align), _round_up(M, row_align))
    ti_eff = min(_round_up(ti_target, 128), _round_up(I, 128))
    tm_eff, ti_eff = _fit_tiles(tm_eff, ti_eff, H, xbytes, wbytes, budget,
                                xo_bufs, row_align)

    # v7x has 2 TensorCores sharded over the "parallel" M axis; make sure a
    # small-M (decode) call still produces >= 2 M blocks so both cores run.
    if small_vmem and M >= 2 * row_align and _round_up(M, tm_eff) // tm_eff < 2:
        tm_eff = _round_up((M + 1) // 2, row_align)

    Mp = _round_up(M, tm_eff)
    if Mp != M:
        x2 = jnp.pad(x2, ((0, Mp - M), (0, 0)))   # zero rows -> zero outputs

    # ---- Pad I to a ti multiple so all DMAs/stores stay lane-dense. ---------
    Ip = _round_up(I, ti_eff)
    if Ip != I:
        # Padded gate/up columns give silu(0)*0 == 0 and the matching down rows
        # are zero too, so padding cannot change the result.
        w_gate = jnp.pad(w_gate, ((0, 0), (0, Ip - I)))
        w_up = jnp.pad(w_up, ((0, 0), (0, Ip - I)))
        w_down = jnp.pad(w_down, ((0, Ip - I), (0, 0)))
    nI = Ip // ti_eff

    # ---- Fuse gate/up into one [gate_j | up_j]-interleaved slab so the kernel
    # does a single (tm,H)x(H,2*ti) MXU matmul per step.  (In a real model this
    # re-layout would be done once at weight-load time.)
    w_gu = jnp.stack(
        [w_gate.reshape(H, nI, ti_eff), w_up.reshape(H, nI, ti_eff)], axis=2
    ).reshape(H, 2 * Ip)

    est = _tile_footprint(tm_eff, ti_eff, H, xbytes, wbytes, xo_bufs)
    if vmem_limit_bytes is None:
        vmem_limit_bytes = int(min(budget, max(2 * est, 32 * 2**20)))

    grid = (Mp // tm_eff, nI)

    if small_vmem:
        # x/out block indices do not change along the reduction axis j, so
        # double-buffering them only burns VMEM on the 64 MiB parts.
        x_spec = pl.BlockSpec((tm_eff, H), lambda i, j: (i, 0),
                              pipeline_mode=pl.Buffered(1))
        o_spec = pl.BlockSpec((tm_eff, H), lambda i, j: (i, 0),
                              pipeline_mode=pl.Buffered(1))
    else:
        x_spec = pl.BlockSpec((tm_eff, H), lambda i, j: (i, 0))
        o_spec = pl.BlockSpec((tm_eff, H), lambda i, j: (i, 0))

    out2 = pl.pallas_call(
        functools.partial(mlp_kernel, ti=ti_eff),
        out_shape=jax.ShapeDtypeStruct((Mp, H), x.dtype),
        grid_spec=pltpu.PrefetchScalarGridSpec(
            num_scalar_prefetch=0,
            grid=grid,
            in_specs=[
                x_spec,                                              # x tile
                pl.BlockSpec((H, 2 * ti_eff), lambda i, j: (0, j)),  # [gate|up] tile
                pl.BlockSpec((ti_eff, H), lambda i, j: (j, 0)),      # down tile
            ],
            out_specs=o_spec,
            scratch_shapes=[pltpu.VMEM((tm_eff, H), jnp.float32)],
        ),
        compiler_params=pltpu.CompilerParams(
            dimension_semantics=("parallel", "arbitrary"),
            vmem_limit_bytes=vmem_limit_bytes,
        ),
    )(x2, w_gu, w_down)

    return out2[:M].reshape(B, S, H)


def mlp_reference(x, w_gate, w_up, w_down):
    xf = x.astype(jnp.float32)
    gate = jnp.einsum("bsh,hi->bsi", xf, w_gate.astype(jnp.float32))
    up = jnp.einsum("bsh,hi->bsi", xf, w_up.astype(jnp.float32))
    h = gate * jax.nn.sigmoid(gate) * up
    return jnp.einsum("bsi,ih->bsh", h, w_down.astype(jnp.float32))


if __name__ == "__main__":
    # Small synthetic config: hidden_size=32, intermediate_size=64,
    # hidden_act="silu", mlp_bias=False.
    B, S, H, I = 2, 8, 32, 64
    key = jax.random.PRNGKey(0)
    kx, kg, ku, kd = jax.random.split(key, 4)

    x = jax.random.normal(kx, (B, S, H), dtype=jnp.float32)
    # Deterministic parameter init (scaled normals); stored as [in, out].
    w_gate = jax.random.normal(kg, (H, I), dtype=jnp.float32) * (1.0 / H**0.5)
    w_up = jax.random.normal(ku, (H, I), dtype=jnp.float32) * (1.0 / H**0.5)
    w_down = jax.random.normal(kd, (I, H), dtype=jnp.float32) * (1.0 / I**0.5)

    # f32 path: tight check against the reference.
    out = jax.block_until_ready(mlp_pallas(x, w_gate, w_up, w_down))
    ref = mlp_reference(x, w_gate, w_up, w_down)
    assert out.shape == (B, S, H)
    assert jnp.allclose(out, ref, atol=1e-4, rtol=1e-4)

    # bf16 path (bf16 MXU inputs, f32 accumulation in-kernel): loose check.
    xb, gb, ub, db = (a.astype(jnp.bfloat16) for a in (x, w_gate, w_up, w_down))
    out_bf16 = jax.block_until_ready(mlp_pallas(xb, gb, ub, db))
    ref_bf16 = mlp_reference(xb, gb, ub, db)
    assert out_bf16.shape == (B, S, H)
    assert jnp.allclose(out_bf16.astype(jnp.float32), ref_bf16, atol=1e-1, rtol=1e-1)

    print("KERNEL_OK")
</pallas_src>

<mosaic_0001>
module attributes {stable_mosaic.version = 11 : i64} {
  func.func @mlp_kernel(%arg0: i32, %arg1: i32, %arg2: memref<16x32xf32, #tpu.memory_space<vmem>>, %arg3: memref<32x256xf32, #tpu.memory_space<vmem>>, %arg4: memref<128x32xf32, #tpu.memory_space<vmem>>, %arg5: memref<16x32xf32, #tpu.memory_space<vmem>>, %arg6: memref<16x32xf32, #tpu.memory_space<vmem>>) attributes {dimension_semantics = [#tpu.dimension_semantics<parallel>, #tpu.dimension_semantics<arbitrary>], iteration_bounds = array<i64: 1, 1>, scalar_prefetch = 0 : i64, scratch_operands = 1 : i64, tpu.core_type = #tpu.core_type<tc>, window_params = [{transform_indices = @transform_0, window_bounds = array<i64: 16, 32>}, {transform_indices = @transform_1, window_bounds = array<i64: 32, 256>}, {transform_indices = @transform_2, window_bounds = array<i64: 128, 32>}, {transform_indices = @transform_3, window_bounds = array<i64: 16, 32>}]} {
    %c0 = arith.constant 0 : index
    %c0_0 = arith.constant 0 : index
    %0 = vector.load %arg2[%c0, %c0_0] : memref<16x32xf32, #tpu.memory_space<vmem>>, vector<16x32xf32>
    %c0_1 = arith.constant 0 : index
    %c0_2 = arith.constant 0 : index
    %1 = vector.load %arg3[%c0_1, %c0_2] : memref<32x256xf32, #tpu.memory_space<vmem>>, vector<32x256xf32>
    %cst = arith.constant dense<0.000000e+00> : vector<16x256xf32>
    %2 = tpu.matmul %0, %1, %cst {dimension_numbers = #tpu.dot_dimension_numbers<[1], [0], [0], [1], [0, 0, 1, 1], [], []>} : vector<16x32xf32>, vector<32x256xf32>, vector<16x256xf32> -> vector<16x256xf32>
    %3 = vector.extract_strided_slice %2 {offsets = [0, 0], sizes = [16, 128], strides = [1, 1]} : vector<16x256xf32> to vector<16x128xf32>
    %4 = vector.extract_strided_slice %2 {offsets = [0, 128], sizes = [16, 128], strides = [1, 1]} : vector<16x256xf32> to vector<16x128xf32>
    %5 = arith.negf %3 : vector<16x128xf32>
    %6 = math.exp %5 : vector<16x128xf32>
    %cst_3 = arith.constant 1.000000e+00 : f32
    %7 = vector.broadcast %cst_3 : f32 to vector<16x128xf32>
    %8 = arith.addf %7, %6 : vector<16x128xf32>
    %9 = arith.divf %7, %8 : vector<16x128xf32>
    %10 = arith.mulf %3, %9 : vector<16x128xf32>
    %11 = arith.mulf %10, %4 : vector<16x128xf32>
    %c0_4 = arith.constant 0 : index
    %c0_5 = arith.constant 0 : index
    %12 = vector.load %arg4[%c0_4, %c0_5] : memref<128x32xf32, #tpu.memory_space<vmem>>, vector<128x32xf32>
    %cst_6 = arith.constant dense<0.000000e+00> : vector<16x32xf32>
    %13 = tpu.matmul %11, %12, %cst_6 {dimension_numbers = #tpu.dot_dimension_numbers<[1], [0], [0], [1], [0, 0, 1, 1], [], []>} : vector<16x128xf32>, vector<128x32xf32>, vector<16x32xf32> -> vector<16x32xf32>
    %c0_i32 = arith.constant 0 : i32
    %14 = arith.cmpi eq, %arg1, %c0_i32 : i32
    %15 = arith.extui %14 : i1 to i32
    %c0_i32_7 = arith.constant 0 : i32
    %16 = arith.cmpi ne, %15, %c0_i32_7 : i32
    scf.if %16 {
      %c0_12 = arith.constant 0 : index
      %c0_13 = arith.constant 0 : index
      %23 = vector.load %arg6[%c0_12, %c0_13] : memref<16x32xf32, #tpu.memory_space<vmem>>, vector<16x32xf32>
      tpu.vector_store %arg6[%c0_12, %c0_13], %13 {strides = array<i32>} : memref<16x32xf32, #tpu.memory_space<vmem>>, vector<16x32xf32>,
    } else {
    }
    %c0_i32_8 = arith.constant 0 : i32
    %17 = arith.cmpi sgt, %arg1, %c0_i32_8 : i32
    %18 = arith.extui %17 : i1 to i32
    %c0_i32_9 = arith.constant 0 : i32
    %19 = arith.cmpi ne, %18, %c0_i32_9 : i32
    scf.if %19 {
      %c0_12 = arith.constant 0 : index
      %c0_13 = arith.constant 0 : index
      %23 = vector.load %arg6[%c0_12, %c0_13] : memref<16x32xf32, #tpu.memory_space<vmem>>, vector<16x32xf32>
      %24 = arith.addf %23, %13 : vector<16x32xf32>
      %c0_14 = arith.constant 0 : index
      %c0_15 = arith.constant 0 : index
      %25 = vector.load %arg6[%c0_14, %c0_15] : memref<16x32xf32, #tpu.memory_space<vmem>>, vector<16x32xf32>
      tpu.vector_store %arg6[%c0_14, %c0_15], %24 {strides = array<i32>} : memref<16x32xf32, #tpu.memory_space<vmem>>, vector<16x32xf32>,
    } else {
    }
    %c0_i32_10 = arith.constant 0 : i32
    %20 = arith.cmpi eq, %arg1, %c0_i32_10 : i32
    %21 = arith.extui %20 : i1 to i32
    %c0_i32_11 = arith.constant 0 : i32
    %22 = arith.cmpi ne, %21, %c0_i32_11 : i32
    scf.if %22 {
      %c0_12 = arith.constant 0 : index
      %c0_13 = arith.constant 0 : index
      %23 = vector.load %arg6[%c0_12, %c0_13] : memref<16x32xf32, #tpu.memory_space<vmem>>, vector<16x32xf32>
      %c0_14 = arith.constant 0 : index
      %c0_15 = arith.constant 0 : index
      %24 = vector.load %arg5[%c0_14, %c0_15] : memref<16x32xf32, #tpu.memory_space<vmem>>, vector<16x32xf32>
      tpu.vector_store %arg5[%c0_14, %c0_15], %23 {strides = array<i32>} : memref<16x32xf32, #tpu.memory_space<vmem>>, vector<16x32xf32>,
    } else {
    }
    return
  }
  func.func @transform_0(%arg0: i32, %arg1: i32) -> (i32, i32) {
    %c0_i32 = arith.constant 0 : i32
    %c0_i32_0 = arith.constant 0 : i32
    return %arg0, %c0_i32 : i32, i32
  }
  func.func @transform_1(%arg0: i32, %arg1: i32) -> (i32, i32) {
    %c0_i32 = arith.constant 0 : i32
    %c0_i32_0 = arith.constant 0 : i32
    return %c0_i32, %arg1 : i32, i32
  }
  func.func @transform_2(%arg0: i32, %arg1: i32) -> (i32, i32) {
    %c0_i32 = arith.constant 0 : i32
    %c0_i32_0 = arith.constant 0 : i32
    return %arg1, %c0_i32 : i32, i32
  }
  func.func @transform_3(%arg0: i32, %arg1: i32) -> (i32, i32) {
    %c0_i32 = arith.constant 0 : i32
    %c0_i32_0 = arith.constant 0 : i32
    return %arg0, %c0_i32 : i32, i32
  }
}

</mosaic_0001>

<bundles_post_ra>
// kernel: tpu_custom_call.1
= control target key start
LH: loop header
LB: loop body
LE: loop exit
PB: predicated region body
PF: predicated region fallthrough
CT: control target
= control target key end

     0   :  { %v388_v7 = vmov 0.0   ;;  %s508_s0 = inlined_call_operand.vmem [shape: f32[16,32], index: 0, kind: input, shape index: {}]   ;;  %s509_s1 = inlined_call_operand.vmem [shape: f32[32,256], index: 1, kind: input, shape index: {}]   ;;  %s510_s2 = inlined_call_operand.vmem [shape: f32[128,32], index: 2, kind: input, shape index: {}]   ;;  %s511_s3 = inlined_call_operand.hbm [shape: f32[16,32], index: 3, kind: output, shape index: {}]  }
   0x1   :  { %v18_v0 = vld [vmem:[%s509_s1 + $0x8] sm:$0xff]  ;;  %v20_v1 = vld [vmem:[%s509_s1 + $0x18] sm:$0xff]  ;;  %v17_v2 = vld [vmem:[%s509_s1] sm:$0xff]  ;;  %96 = vmatprep.mubr.f32.mxu0 %v388_v7 }
   0x2   :  { %v312_v3 = vpack.c.bf16 %v20_v1, %v18_v0  ;;  %v19_v4 = vld [vmem:[%s509_s1 + $0x10] sm:$0xff]  ;;  %v22_v5 = vld [vmem:[%s509_s1 + $0x28] sm:$0xff]  ;;  %v24_v6 = vld [vmem:[%s509_s1 + $0x38] sm:$0xff] }
   0x3   :  { %v314_v8 = vpack.c.bf16 %v19_v4, %v17_v2  ;;  %v316_v9 = vpack.c.bf16 %v24_v6, %v22_v5  ;;  %v21_v10 = vld [vmem:[%s509_s1 + $0x20] sm:$0xff]  ;;  %v23_v11 = vld [vmem:[%s509_s1 + $0x30] sm:$0xff] }
   0x4   :  { %313 = vmatprep.subr.bf16.mxu0 %v312_v3 }
   0x5   :  { %8 = vsyncpa [#allocation4], 0  ;;  %315 = vmatpush1.bf16.msra.mxu0 %v314_v8  ;;  %v318_v12 = vpack.c.bf16 %v23_v11, %v21_v10  ;;  %v15_v13 = vld [vmem:[%s508_s0] sm:$0xff]  ;;  %vm25_vm0 = vcmask 261120   ;;  %v16_v14 = vld [vmem:[%s508_s0 + $0x8] sm:$0xff] }
   0x6   :  { %317 = vmatprep.subr.bf16.mxu0 %v316_v9  ;;  %v125_v15 = vld [vmem:[%s510_s2] sm:$0xff]  ;;  %v126_v16 = vld [vmem:[%s510_s2 + $0x8] sm:$0xff]  ;;  %v127_v18 = vld [vmem:[%s510_s2 + $0x10] sm:$0xff] }
   0x7   :  { %v320_v17 = vpack.c.bf16 %v126_v16, %v125_v15  ;;  %v128_v19 = vld [vmem:[%s510_s2 + $0x18] sm:$0xff]  ;;  %v129_v21 = vld [vmem:[%s510_s2 + $0x20] sm:$0xff]  ;;  %v130_v22 = vld [vmem:[%s510_s2 + $0x28] sm:$0xff] }
   0x8   :  { %v324_v20 = vpack.c.bf16 %v128_v19, %v127_v18  ;;  %v328_v23 = vpack.c.bf16 %v130_v22, %v129_v21  ;;  %v131_v24 = vld [vmem:[%s510_s2 + $0x30] sm:$0xff]  ;;  %v132_v25 = vld [vmem:[%s510_s2 + $0x38] sm:$0xff]  ;;  %v133_v27 = vld [vmem:[%s510_s2 + $0x40] sm:$0xff] }
   0x9   :  { %319 = vmatpush1.bf16.msra.mxu0 %v318_v12  ;;  %321 = vmatprep.subr.bf16.mxu1 %v320_v17  ;;  %v332_v26 = vpack.c.bf16 %v132_v25, %v131_v24  ;;  %v134_v28 = vld [vmem:[%s510_s2 + $0x48] sm:$0xff]  ;;  %v135_v30 = vld [vmem:[%s510_s2 + $0x50] sm:$0xff]  ;;  %v136_v31 = vld [vmem:[%s510_s2 + $0x58] sm:$0xff] }
   0xa   :  { %323 = vmatpush3.bf16.msra.mxu1 %v320_v17  ;;  %v336_v29 = vpack.c.bf16 %v134_v28, %v133_v27  ;;  %v340_v32 = vpack.c.bf16 %v136_v31, %v135_v30  ;;  %v137_v33 = vld [vmem:[%s510_s2 + $0x60] sm:$0xff]  ;;  %v138_v34 = vld [vmem:[%s510_s2 + $0x68] sm:$0xff]  ;;  %v139_v36 = vld [vmem:[%s510_s2 + $0x70] sm:$0xff] }
   0xb   :  { %325 = vmatprep.subr.bf16.mxu1 %v324_v20  ;;  %v344_v35 = vpack.c.bf16 %v138_v34, %v137_v33  ;;  %v140_v37 = vld [vmem:[%s510_s2 + $0x78] sm:$0xff]  ;;  %s389_s2 = smov [#allocation3]  }
   0xc   :  { %255 = vmatmul.mubr.msk.f32.vlgmr.msra.gmra.mrb[0].mxu0 %vm25_vm0, %v15_v13  ;;  %v348_v38 = vpack.c.bf16 %v140_v37, %v139_v36  ;;  %s244_s7 = sshll.u32 %s389_s2, 4  ;;  %s245_s7 = int_to_ptr.vmem [resolvable:$true] %s244_s7 }
   0xd   :  { %102 = vmatprep.mubr.f32.mxu0 %v388_v7  ;;  %s364_s8 = scalar_lea.vmem %s245_s7, 256  ;;  %p369_p1 = scmp.lt.s32.totalorder %s245_s7, %s245_s7 }
   0xe   :  { %327 = vmatpush3.bf16.msra.mxu1 %v324_v20  ;;  %p365_p0 = scmp.ne.s32.totalorder %s245_s7, %s364_s8  ;;  %p370_p2 = scmp.lt.s32.totalorder %s364_s8, %s364_s8 }
   0xf   :  { %329 = vmatprep.subr.bf16.mxu1 %v328_v23 }
  0x10   :  { %256 = vmatmul.mubr.msk.f32.gmra.mrb[2].mxu0 %vm25_vm0, %v16_v14  ;;  %p371_p3 = por %p370_p2, %p369_p1 }
  0x12   :  { %331 = vmatpush3.bf16.msra.mxu1 %v328_v23  ;;  %p372_p4 = pnand %p371_p3, %p365_p0 }
  0x13   :  { %333 = vmatprep.subr.bf16.mxu1 %v332_v26 }
  0x16   :  { %335 = vmatpush3.bf16.msra.mxu1 %v332_v26 }
  0x17   :  { %337 = vmatprep.subr.bf16.mxu1 %v336_v29 }
  0x1a   :  { %339 = vmatpush3.bf16.msra.mxu1 %v336_v29 }
  0x1b   :  { %341 = vmatprep.subr.bf16.mxu1 %v340_v32 }
  0x1e   :  { %343 = vmatpush3.bf16.msra.mxu1 %v340_v32 }
  0x1f   :  { %345 = vmatprep.subr.bf16.mxu1 %v344_v35 }
  0x22   :  { %347 = vmatpush3.bf16.msra.mxu1 %v344_v35 }
  0x23   :  { %349 = vmatprep.subr.bf16.mxu1 %v348_v38 }
  0x26   :  { %351 = vmatpush3.bf16.msra.mxu1 %v348_v38 }
  0xdf   :  { %v98_v39 = vpop.f32.mrb[0].mxu0 }
  0xe0   :  { %v257_v40 = vmul.f32 -1.442695, %v98_v39  ;;  %v100_v41 = vpop.f32.mrb[1].mxu0 }
  0xe2   :  { %356 = vpow2.f32 %v257_v40 }
  0xe3   :  { %v104_v42 = vpop.f32.mrb[2].mxu0 }
  0xe4   :  { %v258_v43 = vmul.f32 -1.442695, %v104_v42  ;;  %v106_v44 = vpop.f32.mrb[3].mxu0 }
  0xe6   :  { %358 = vpow2.f32 %v258_v43 }
  0xec   :  { %v357_v45 = vpop.eup %356 }
  0xed   :  { %v115_v46 = vadd.f32 1.0, %v357_v45 }
  0xef   :  { %360 = vrcp.f32 %v115_v46 }
  0xf0   :  { %v359_v47 = vpop.eup %358 }
  0xf1   :  { %v116_v48 = vadd.f32 1.0, %v359_v47 }
  0xf3   :  { %362 = vrcp.f32 %v116_v48 }
  0xf9   :  { %v361_v49 = vpop.eup %360 }
  0xfa   :  { %v121_v50 = vmul.f32 %v361_v49, %v98_v39 }
  0xfc   :  { %v123_v51 = vmul.f32 %v121_v50, %v100_v41 }
  0xfd   :  { %v363_v52 = vpop.eup %362 }
  0xfe   :  { %v122_v53 = vmul.f32 %v363_v52, %v104_v42  ;;  %309 = vmatprep.mubr.f32.mxu1 %v123_v51 }
 0x100   :  { %v124_v54 = vmul.f32 %v122_v53, %v106_v44 }
 0x102   :  { %310 = vmatmul.mubr.f32.vlgmr.msra.gmra.mrb[0].mxu1 %v124_v54 }
 0x1d5   :  { %v311_v55 = vpop.f32.mrb[0].mxu1 }
 0x1d6   :  { %221 = vst.msk [vmem:[#allocation2 + $0x8] sm:$0xff] %vm25_vm0, %v311_v55  ;;  %v207_v56 = vpop.f32.mrb[1].mxu1 }
 0x1d7   :  { %220 = vst.msk [vmem:[#allocation2] sm:$0xff] %vm25_vm0, %v207_v56 }
 0x1dd   :  { %v236_v57 = vld [vmem:[#allocation2 + $0x8] sm:$0xff] }
 0x1de   :  { %v235_v58 = vld [vmem:[#allocation2] sm:$0xff]  ;;  %238 = vst.msk [vmem:[#allocation3 + $0x8] sm:$0xff] %vm25_vm0, %v236_v57 }
 0x1df   :  { %237 = vst.msk [vmem:[#allocation3] sm:$0xff] %vm25_vm0, %v235_v58 }
 0x1e0   :  { %375 = shalt.err (!%p372_p4)
}
 0x1e1   :  { %s376_s11 = scalar_lea.hbm %s511_s3, 256 }
 0x1e2   :  { %p377_p5 = scmp.ne.s32.totalorder %s511_s3, %s376_s11  ;;  %p380_p6 = scmp.lt.u32.totalorder %s376_s11, %s511_s3 }
 0x1e4   :  { %p382_p7 = pnand %p380_p6, %p377_p5 }
 0x1e6   :  { %385 = shalt.err (!%p382_p7)
}
 0x1e7   :  { %s390_s15 = smov 128   ;;  %s391_s16 = smov 8  }
 0x1e8   :  { %250 = dma.vmem_to_hbm [thread:$0]  %s245_s7, 256, %s511_s3, [#allocation4], %s390_s15, %s390_s15, %s391_s16  }
 0x1e9   :  { %386 = dma.done.wait [#allocation4], 256  }
 0x1ea   :  { %387 = vsyncadd [#allocation4], 4294967040 }
 0x1eb   :  { %254 = vsyncpa [#allocation4], 1 }

</bundles_post_ra>
